<compile_context>
chip_gen: v5e
topology: v5e:2x2
jax: 0.10.0
libtpu: 0.0.40
codegen_flags: <defaults>
</compile_context>

<pallas_src>
import functools

import jax
import jax.numpy as jnp
from jax.experimental import pallas as pl
from jax.experimental.pallas import tpu as pltpu


def _round_up(x, m):
    return ((x + m - 1) // m) * m


def _cdiv(a, b):
    return -(-a // b)


# ----------------------------------------------------------------------------
# Kernel
# ----------------------------------------------------------------------------
def cdefunc_kernel(z_ref, w1_ref, b1_ref, w2_ref, b2_ref, o_ref):
    # z arrives f32; cast to bf16 in-kernel (cheap VPU op hidden under matmul).
    z = z_ref[...].astype(w1_ref.dtype)
    # linear1 + relu : (TB, H) @ (H, HH_pad) -> (TB, HH_pad), f32 accumulate.
    h = jnp.dot(z, w1_ref[...], preferred_element_type=jnp.float32)
    h = jnp.maximum(h + b1_ref[...], 0.0)
    # linear2 + tanh : (TB, HH_pad) @ (HH_pad, OUT_pad) -> (TB, OUT_pad).
    y = jnp.dot(h.astype(w2_ref.dtype), w2_ref[...],
                preferred_element_type=jnp.float32)
    o_ref[...] = jnp.tanh(y + b2_ref[...]).astype(o_ref.dtype)


# ----------------------------------------------------------------------------
# Tile / VMEM budgeting
# ----------------------------------------------------------------------------
_VMEM_BUDGET = 24 * 1024 * 1024     # conservative working-set budget
_VMEM_LIMIT_CAP = 32 * 1024 * 1024  # headroom even on v7x's 64 MiB physical
_MEGACORE_MIN_ROWS = 512            # above this, force >= 2 even grid steps


def _footprint_bytes(tb, H, HH_pad, OUT_pad, out_itemsize):
    # Weights/biases have constant index_maps -> resident, single buffer.
    w_bytes = (H * HH_pad + HH_pad * OUT_pad) * 2 + (HH_pad + OUT_pad) * 4
    # Per-tile f32 z input + output tile, double-buffered by the pipeline.
    tile_bytes = tb * H * 4 + tb * OUT_pad * out_itemsize
    # In-kernel f32 intermediates (h and y).
    inter_bytes = tb * HH_pad * 4 + tb * OUT_pad * 4
    return w_bytes + 2 * tile_bytes + inter_bytes


def _choose_tb(b_pad, H, HH_pad, OUT_pad, out_itemsize):
    # Large tiles amortize the ~0.35 us per-grid-step overhead; back off only
    # if the working set blows the VMEM budget.
    tb = min(2048, _round_up(b_pad, 8))
    tb = max(8, (tb // 8) * 8)
    while tb > 8 and _footprint_bytes(tb, H, HH_pad, OUT_pad,
                                      out_itemsize) > _VMEM_BUDGET:
        tb = max(8, ((tb // 2) // 8) * 8)
    # v7x megacore: guarantee an even 2-way split for moderately large batches
    # so the "parallel" axis actually uses both TensorCores.
    if b_pad >= _MEGACORE_MIN_ROWS:
        half = _round_up(_cdiv(b_pad, 2), 8)
        tb = min(tb, half)
    return tb


# ----------------------------------------------------------------------------
# One-time parameter preparation (hoisted out of the per-step call)
# ----------------------------------------------------------------------------
def prepare_params(params):
    """Pad + cast weights once (call before the ODE solve, not per step).

    params: (w1 (H,HH), b1 (1,HH), w2 (HH,OUT), b2 (1,OUT)), all f32,
            weights stored pre-transposed (in_features, out_features).
    """
    w1, b1, w2, b2 = params
    H, HH = w1.shape
    OUT = w2.shape[1]
    HH_pad = _round_up(HH, 128)   # lane-dense intermediate h, full-K 2nd matmul
    OUT_pad = _round_up(OUT, 128)  # lane-dense output stores (no masked vst)

    # Zero-padding is exact: relu(0 + 0) = 0 in the padded h columns, and the
    # corresponding zero rows of w2 contribute nothing to the output.
    w1_p = jnp.pad(w1, ((0, 0), (0, HH_pad - HH))).astype(jnp.bfloat16)
    b1_p = jnp.pad(b1, ((0, 0), (0, HH_pad - HH)))                 # f32
    w2_p = jnp.pad(w2, ((0, HH_pad - HH), (0, OUT_pad - OUT))).astype(
        jnp.bfloat16)
    b2_p = jnp.pad(b2, ((0, 0), (0, OUT_pad - OUT)))               # f32

    meta = dict(H=H, HH=HH, OUT=OUT, HH_pad=HH_pad, OUT_pad=OUT_pad)
    return (w1_p, b1_p, w2_p, b2_p), meta


# ----------------------------------------------------------------------------
# Wrapper
# ----------------------------------------------------------------------------
def cdefunc_forward(t, z, prepared, meta, *, input_channels, hidden_channels,
                    out_dtype=jnp.float32):
    """Pallas-fused forward of CDEFunc_c.

    z: (B, hidden_channels) float32
    returns: (B, hidden_channels, input_channels) in `out_dtype`
             (bf16 halves the dominant HBM write traffic; tanh output in
              [-1,1] so bf16 is usually acceptable).
    """
    del t  # unused, kept for signature parity with PyTorch forward(t, z)
    w1_p, b1_p, w2_p, b2_p = prepared
    B, H = z.shape
    assert H == meta["H"]
    HH_pad, OUT_pad, OUT = meta["HH_pad"], meta["OUT_pad"], meta["OUT"]
    out_itemsize = jnp.dtype(out_dtype).itemsize

    b8 = _round_up(B, 8)
    TB = _choose_tb(b8, H, HH_pad, OUT_pad, out_itemsize)
    B_pad = _round_up(b8, TB)
    z_p = jnp.pad(z, ((0, B_pad - B), (0, 0)))   # stays f32 (cast in-kernel)

    footprint = _footprint_bytes(TB, H, HH_pad, OUT_pad, out_itemsize)
    vmem_limit = int(min(_VMEM_LIMIT_CAP,
                         max(4 * 1024 * 1024, int(1.5 * footprint))))

    cost = pl.CostEstimate(
        flops=2 * B_pad * (H * HH_pad + HH_pad * OUT_pad),
        transcendentals=B_pad * OUT_pad,                         # tanh
        bytes_accessed=(B_pad * H * 4                            # z (f32)
                        + (H * HH_pad + HH_pad * OUT_pad) * 2    # bf16 weights
                        + (HH_pad + OUT_pad) * 4                 # f32 biases
                        + B_pad * OUT_pad * out_itemsize))       # output

    if B_pad <= TB:
        # Tiny / latency-bound case: single block, whole operands resident in
        # VMEM, no grid -> no dead double buffers or pipeline bookkeeping.
        flat = pl.pallas_call(
            cdefunc_kernel,
            out_shape=jax.ShapeDtypeStruct((B_pad, OUT_pad), out_dtype),
            in_specs=[pl.BlockSpec(memory_space=pltpu.MemorySpace.VMEM)] * 5,
            out_specs=pl.BlockSpec(memory_space=pltpu.MemorySpace.VMEM),
            compiler_params=pltpu.CompilerParams(
                vmem_limit_bytes=vmem_limit),
            cost_estimate=cost,
        )(z_p, w1_p, b1_p, w2_p, b2_p)
    else:
        grid = (B_pad // TB,)
        flat = pl.pallas_call(
            cdefunc_kernel,
            out_shape=jax.ShapeDtypeStruct((B_pad, OUT_pad), out_dtype),
            grid=grid,
            in_specs=[
                pl.BlockSpec((TB, H), lambda i: (i, 0)),          # z: tiled
                pl.BlockSpec((H, HH_pad), lambda i: (0, 0)),      # w1: resident
                pl.BlockSpec((1, HH_pad), lambda i: (0, 0)),      # b1: resident
                pl.BlockSpec((HH_pad, OUT_pad), lambda i: (0, 0)),  # w2
                pl.BlockSpec((1, OUT_pad), lambda i: (0, 0)),     # b2
            ],
            out_specs=pl.BlockSpec((TB, OUT_pad), lambda i: (i, 0)),
            compiler_params=pltpu.CompilerParams(
                dimension_semantics=("parallel",),   # megacore on v7x
                vmem_limit_bytes=vmem_limit),
            cost_estimate=cost,
        )(z_p, w1_p, b1_p, w2_p, b2_p)

    # torch: z.view(B, hidden_channels, input_channels) (row-major reshape).
    flat = flat[:B, :OUT]
    return flat.reshape(B, hidden_channels, input_channels)


# ----------------------------------------------------------------------------
# Parameters / references
# ----------------------------------------------------------------------------
def init_params(key, input_channels, hidden_channels, hidden_hidden_channels):
    """Deterministic init mimicking torch.nn.Linear default U[-1/sqrt(fan_in), +]."""
    k1, k2, k3, k4 = jax.random.split(key, 4)
    bound1 = 1.0 / jnp.sqrt(hidden_channels)
    bound2 = 1.0 / jnp.sqrt(hidden_hidden_channels)
    out2 = input_channels * hidden_channels
    # Stored pre-transposed: (in_features, out_features)
    w1 = jax.random.uniform(k1, (hidden_channels, hidden_hidden_channels),
                            jnp.float32, -bound1, bound1)
    b1 = jax.random.uniform(k2, (1, hidden_hidden_channels),
                            jnp.float32, -bound1, bound1)
    w2 = jax.random.uniform(k3, (hidden_hidden_channels, out2),
                            jnp.float32, -bound2, bound2)
    b2 = jax.random.uniform(k4, (1, out2), jnp.float32, -bound2, bound2)
    return w1, b1, w2, b2


def _ref_bf16(z, params):
    """Plain-JAX reference with the same bf16-input / f32-accumulate dtype path."""
    w1, b1, w2, b2 = params
    h = jnp.dot(z.astype(jnp.bfloat16), w1.astype(jnp.bfloat16),
                preferred_element_type=jnp.float32) + b1
    h = jnp.maximum(h, 0.0)
    y = jnp.dot(h.astype(jnp.bfloat16), w2.astype(jnp.bfloat16),
                preferred_element_type=jnp.float32) + b2
    return jnp.tanh(y)


def _ref_f32(z, params):
    """Full-f32 reference (matches the PyTorch module's math)."""
    w1, b1, w2, b2 = params
    return jnp.tanh(jnp.maximum(z @ w1 + b1, 0.0) @ w2 + b2)


# ----------------------------------------------------------------------------
# Demo / self-check
# ----------------------------------------------------------------------------
if __name__ == "__main__":
    input_channels = 4
    hidden_channels = 32
    hidden_hidden_channels = 64

    key = jax.random.PRNGKey(0)
    kp, kz1, kz2 = jax.random.split(key, 3)
    params = init_params(kp, input_channels, hidden_channels,
                         hidden_hidden_channels)
    prepared, meta = prepare_params(params)   # one-time weight prep
    t = jnp.float32(0.0)

    fwd = functools.partial(cdefunc_forward, prepared=prepared, meta=meta,
                            input_channels=input_channels,
                            hidden_channels=hidden_channels)

    # Case 1: tiny batch (single-block, no-grid path).
    z_small = jax.random.normal(kz1, (8, hidden_channels), jnp.float32)
    out_small = jax.block_until_ready(fwd(t, z_small))

    # Case 2: larger batch (batch-tiled, 2-way "parallel" grid on v7x).
    z_big = jax.random.normal(kz2, (640, hidden_channels), jnp.float32)
    out_big = jax.block_until_ready(fwd(t, z_big))

    # Case 3: bf16-output path (halves output HBM write traffic).
    out_big_bf16 = jax.block_until_ready(fwd(t, z_big, out_dtype=jnp.bfloat16))

    def check(z, out, atol_bf, atol_f32):
        B = z.shape[0]
        assert out.shape == (B, hidden_channels, input_channels)
        o = out.astype(jnp.float32)
        ref_bf = _ref_bf16(z, params).reshape(B, hidden_channels,
                                              input_channels)
        ref32 = _ref_f32(z, params).reshape(B, hidden_channels,
                                            input_channels)
        assert jnp.allclose(o, ref_bf, atol=atol_bf, rtol=2e-3), \
            f"mismatch vs bf16 ref: {jnp.max(jnp.abs(o - ref_bf))}"
        assert jnp.allclose(o, ref32, atol=atol_f32, rtol=0.0), \
            f"mismatch vs f32 ref: {jnp.max(jnp.abs(o - ref32))}"

    check(z_small, out_small, atol_bf=2e-3, atol_f32=5e-2)
    check(z_big, out_big, atol_bf=2e-3, atol_f32=5e-2)
    check(z_big, out_big_bf16, atol_bf=1e-2, atol_f32=6e-2)

    print("KERNEL_OK")
</pallas_src>

<mosaic_0001>
module attributes {stable_mosaic.version = 11 : i64} {
  func.func @cdefunc_kernel(%arg0: memref<8x32xf32, #tpu.memory_space<vmem>>, %arg1: memref<32x128xbf16, #tpu.memory_space<vmem>>, %arg2: memref<1x128xf32, #tpu.memory_space<vmem>>, %arg3: memref<128x128xbf16, #tpu.memory_space<vmem>>, %arg4: memref<1x128xf32, #tpu.memory_space<vmem>>, %arg5: memref<8x128xf32, #tpu.memory_space<vmem>>) attributes {dimension_semantics = [], scalar_prefetch = 0 : i64, scratch_operands = 0 : i64, tpu.core_type = #tpu.core_type<tc>} {
    %c0 = arith.constant 0 : index
    %c0_0 = arith.constant 0 : index
    %0 = vector.load %arg0[%c0, %c0_0] : memref<8x32xf32, #tpu.memory_space<vmem>>, vector<8x32xf32>
    %1 = arith.truncf %0 : vector<8x32xf32> to vector<8x32xbf16>
    %c0_1 = arith.constant 0 : index
    %c0_2 = arith.constant 0 : index
    %2 = vector.load %arg1[%c0_1, %c0_2] : memref<32x128xbf16, #tpu.memory_space<vmem>>, vector<32x128xbf16>
    %cst = arith.constant dense<0.000000e+00> : vector<8x128xf32>
    %3 = tpu.matmul %1, %2, %cst {dimension_numbers = #tpu.dot_dimension_numbers<[1], [0], [0], [1], [0, 0, 1, 1], [], []>} : vector<8x32xbf16>, vector<32x128xbf16>, vector<8x128xf32> -> vector<8x128xf32>
    %c0_3 = arith.constant 0 : index
    %c0_4 = arith.constant 0 : index
    %4 = vector.load %arg2[%c0_3, %c0_4] : memref<1x128xf32, #tpu.memory_space<vmem>>, vector<1x128xf32>
    %5 = vector.broadcast %4 : vector<1x128xf32> to vector<8x128xf32>
    %6 = arith.addf %3, %5 : vector<8x128xf32>
    %cst_5 = arith.constant 0.000000e+00 : f32
    %7 = vector.broadcast %cst_5 : f32 to vector<8x128xf32>
    %8 = arith.maximumf %6, %7 : vector<8x128xf32>
    %9 = arith.truncf %8 : vector<8x128xf32> to vector<8x128xbf16>
    %c0_6 = arith.constant 0 : index
    %c0_7 = arith.constant 0 : index
    %10 = vector.load %arg3[%c0_6, %c0_7] : memref<128x128xbf16, #tpu.memory_space<vmem>>, vector<128x128xbf16>
    %cst_8 = arith.constant dense<0.000000e+00> : vector<8x128xf32>
    %11 = tpu.matmul %9, %10, %cst_8 {dimension_numbers = #tpu.dot_dimension_numbers<[1], [0], [0], [1], [0, 0, 1, 1], [], []>} : vector<8x128xbf16>, vector<128x128xbf16>, vector<8x128xf32> -> vector<8x128xf32>
    %c0_9 = arith.constant 0 : index
    %c0_10 = arith.constant 0 : index
    %12 = vector.load %arg4[%c0_9, %c0_10] : memref<1x128xf32, #tpu.memory_space<vmem>>, vector<1x128xf32>
    %13 = vector.broadcast %12 : vector<1x128xf32> to vector<8x128xf32>
    %14 = arith.addf %11, %13 : vector<8x128xf32>
    %15 = math.tanh %14 : vector<8x128xf32>
    %c0_11 = arith.constant 0 : index
    %c0_12 = arith.constant 0 : index
    %16 = vector.load %arg5[%c0_11, %c0_12] : memref<8x128xf32, #tpu.memory_space<vmem>>, vector<8x128xf32>
    tpu.vector_store %arg5[%c0_11, %c0_12], %15 {strides = array<i32>} : memref<8x128xf32, #tpu.memory_space<vmem>>, vector<8x128xf32>,
    return
  }
}

</mosaic_0001>

<bundles_post_ra>
// kernel: tpu_custom_call.1
= control target key start
LH: loop header
LB: loop body
LE: loop exit
PB: predicated region body
PF: predicated region fallthrough
CT: control target
= control target key end

     0   :  { %10 = vsyncpa [#allocation3], 0  ;;  %s426_s0 = inlined_call_operand.hbm [shape: f32[8,32], index: 0, kind: input, shape index: {}]   ;;  %s427_s1 = inlined_call_operand.hbm [shape: bf16[32,128], index: 1, kind: input, shape index: {}]   ;;  %s428_s2 = inlined_call_operand.vmem [shape: f32[1,128], index: 2, kind: input, shape index: {}]   ;;  %s429_s3 = inlined_call_operand.hbm [shape: bf16[128,128], index: 3, kind: input, shape index: {}]   ;;  %s430_s4 = inlined_call_operand.vmem [shape: f32[1,128], index: 4, kind: input, shape index: {}]   ;;  %s431_s5 = inlined_call_operand.hbm [shape: f32[8,128], index: 5, kind: output, shape index: {}]  }
   0x1   :  { %11 = vsyncpa [#allocation6], 0  ;;  %s28_s20 = sshll.u32 %s427_s1, 4  ;;  %s29_s20 = int_to_ptr.hbm [resolvable:$true] %s28_s20 }
   0x2   :  { %12 = vsyncpa [#allocation4], 0  ;;  %s372_s21 = smov [#allocation5]   ;;  %s18_s25 = sshll.u32 %s426_s0, 4  ;;  %s19_s25 = int_to_ptr.hbm [resolvable:$true] %s18_s25 }
   0x3   :  { %s30_s22 = sshll.u32 %s372_s21, 4  ;;  %s373_s26 = smov 64   ;;  %s31_s22 = int_to_ptr.vmem [resolvable:$true] %s30_s22 }
   0x4   :  { %s374_s27 = smov 4   ;;  %s375_s28 = smov [#allocation2]  }
   0x5   :  { %36 = dma.hbm_to_vmem [thread:$0]  %s29_s20, 256, %s31_s22, [#allocation6], %s373_s26, %s373_s26, %s374_s27  }
   0x6   :  { %s20_s29 = sshll.u32 %s375_s28, 4  ;;  %s43_s7 = sshll.u32 %s429_s3, 4  ;;  %s21_s29 = int_to_ptr.vmem [resolvable:$true] %s20_s29  ;;  %s44_s7 = int_to_ptr.hbm [resolvable:$true] %s43_s7 }
   0x7   :  { %23 = dma.hbm_to_vmem [thread:$0]  %s19_s25, 128, %s21_s29, [#allocation3]  }
   0x8   :  { %s376_s1 = smov [#allocation7]  }
   0x9   :  { %s45_s8 = sshll.u32 %s376_s1, 4  ;;  %s46_s8 = int_to_ptr.vmem [resolvable:$true] %s45_s8 }
   0xa   :  { %51 = dma.hbm_to_vmem [thread:$0]  %s44_s7, 1024, %s46_s8, [#allocation6], %s373_s26, %s373_s26, %s374_s27  }
   0xb   :  { %366 = dma.done.wait [#allocation3], 128  }
   0xc   :  { %367 = vsyncadd [#allocation3], 4294967168 }
   0xd   :  { %368 = dma.done.wait [#allocation6], 1280  }
   0xe   :  { %369 = vsyncadd [#allocation6], 4294966016  ;;  %v251_v0 = vld [vmem:[#allocation5 + $0x8] sm:$0xff]  ;;  %v250_v2 = vld [vmem:[#allocation5] sm:$0xff]  ;;  %vm89_vm0 = vcmask 261120   ;;  %s377_s11 = smov [#allocation8]  }
   0xf   :  { %v259_v1 = vld [vmem:[#allocation7 + $0x38] sm:$0xff]  ;;  %99 = vmatpush.bf16.msra.mxu0 %v251_v0  ;;  %v67_v3 = vld [vmem:[#allocation2] sm:$0xff]  ;;  %v258_v4 = vld [vmem:[#allocation7 + $0x30] sm:$0xff]  ;;  %s196_s12 = sshll.u32 %s377_s11, 4  ;;  %s198_s15 = sshll.u32 %s431_s5, 4  ;;  %s197_s12 = int_to_ptr.vmem [resolvable:$true] %s196_s12  ;;  %s199_s15 = int_to_ptr.hbm [resolvable:$true] %s198_s15 }
  0x10   :  { %176 = vmatpush.bf16.msra.mxu1 %v259_v1  ;;  %v68_v5 = vpack.c.bf16 %v67_v3, %v67_v3  ;;  %v257_v6 = vld [vmem:[#allocation7 + $0x28] sm:$0xff]  ;;  %v256_v7 = vld [vmem:[#allocation7 + $0x20] sm:$0xff]  ;;  %v255_v8 = vld [vmem:[#allocation7 + $0x18] sm:$0xff] }
  0x11   :  { %v254_v9 = vld [vmem:[#allocation7 + $0x10] sm:$0xff]  ;;  %v253_v10 = vld [vmem:[#allocation7 + $0x8] sm:$0xff]  ;;  %v252_v11 = vld [vmem:[#allocation7] sm:$0xff] }
  0x12   :  { %v266_v12 = vld [vmem:[%s428_s2] ss:$0 sm:$0xff] }
  0x13   :  { %100 = vmatpush.bf16.msra.mxu0 %v250_v2  ;;  %v267_v18 = vld [vmem:[%s430_s4] ss:$0 sm:$0xff] }
  0x14   :  { %177 = vmatpush.bf16.msra.mxu1 %v258_v4 }
  0x16   :  { %217 = vmatmul.msk.bf16.vlgmr.msra.gmra.mxu0 %vm89_vm0, %v68_v5 }
  0x18   :  { %178 = vmatpush.bf16.msra.mxu1 %v257_v6 }
  0x1c   :  { %179 = vmatpush.bf16.msra.mxu1 %v256_v7 }
  0x20   :  { %180 = vmatpush.bf16.msra.mxu1 %v255_v8 }
  0x24   :  { %181 = vmatpush.bf16.msra.mxu1 %v254_v9 }
  0x28   :  { %182 = vmatpush.bf16.msra.mxu1 %v253_v10 }
  0x2c   :  { %183 = vmatpush.bf16.msra.mxu1 %v252_v11 }
  0x93   :  { %v102_v13 = vpop.f32.mrf.mxu0 }
  0x94   :  { %v103_v14 = vadd.f32 %v266_v12, %v102_v13 }
  0x96   :  { %v106_v15 = vmax.f32 %v103_v14, 0.0 }
  0x98   :  { %v107_v16 = vpack.c.bf16 %v106_v15, %v106_v15 }
  0x9a   :  { %184 = vmatmul.bf16.vlgmr.msra.gmra.mxu1 %v107_v16 }
  0x9b   :  { %v104_v17 = vpop.f32.mrf.mxu0 }
 0x117   :  { %v185_v19 = vpop.f32.mrf.mxu1 }
 0x118   :  { %v186_v20 = vadd.f32 %v267_v18, %v185_v19 }
 0x11a   :  { %268 = vtanh.f32 %v186_v20 }
 0x11f   :  { %v187_v21 = vpop.f32.mrf.mxu1 }
 0x120   :  { %v269_v22 = vpop.eup %268 }
 0x121   :  { %190 = vst [vmem:[#allocation8] sm:$0xff] %v269_v22 }
 0x122   :  { %201 = dma.vmem_to_hbm [thread:$0]  %s197_s12, 128, %s199_s15, [#allocation4]  }
 0x123   :  { %370 = dma.done.wait [#allocation4], 128  }
 0x124   :  { %371 = vsyncadd [#allocation4], 4294967168 }
 0x125   :  { %206 = vsyncpa [#allocation3], 1 }
 0x126   :  { %207 = vsyncpa [#allocation6], 1 }
 0x127   :  { %208 = vsyncpa [#allocation4], 1 }

</bundles_post_ra>
